<compile_context>
chip_gen: v6e
topology: v6e:2x2x1
jax: 0.10.0
libtpu: 0.0.40
codegen_flags: <defaults>
</compile_context>

<pallas_src>
import functools

import jax
import jax.numpy as jnp
from jax.experimental import pallas as pl
from jax.experimental.pallas import tpu as pltpu


def _actor_critic_kernel(x_ref, w1_ref, b1_ref, w2_ref, b2_ref, out_ref, *,
                         num_outputs):
    """One grid step: [TB, I] input rows -> [TB, OUT_W] slab (value|probs|0)."""
    x = x_ref[...]

    # ---- fused layer 1 (critic | actor): one MXU pass -> [TB, 2H] ----
    h = jnp.dot(x, w1_ref[...], preferred_element_type=jnp.float32) + b1_ref[...]
    h = jnp.maximum(h, 0.0)

    # ---- fused layer 2 (block-diagonal weights): one MXU pass -> [TB, OUT_W]
    # slab[:, 0]       = critic value
    # slab[:, 1:1+O]   = actor logits
    # slab[:, 1+O:]    = 0 (zero weight / bias columns)
    slab = jnp.dot(h, w2_ref[...], preferred_element_type=jnp.float32) + b2_ref[...]

    col = jax.lax.broadcasted_iota(jnp.int32, slab.shape, 1)
    is_logit = jnp.logical_and(col >= 1, col < 1 + num_outputs)

    # numerically-stable softmax restricted to the logit columns.
    # Exact reciprocal: downstream Categorical assumes probs sum to 1.
    logits = jnp.where(is_logit, slab, jnp.float32(-jnp.inf))
    m = jnp.max(logits, axis=1, keepdims=True)
    e = jnp.exp(logits - m)                       # exactly 0 outside logit cols
    denom = jnp.sum(e, axis=1, keepdims=True)
    probs = e / denom

    # col 0 = value, cols 1..O = probs, remaining pad cols = 0
    out = jnp.where(col == 0, slab, probs)
    out_ref[...] = out.astype(out_ref.dtype)


def pack_params(params, num_outputs, hidden_size):
    """Pack PyTorch-shaped per-layer params into the fused kernel layout.

    Call ONCE at init / after each parameter update — NOT per forward.
    """
    h, o = hidden_size, num_outputs
    out_w = ((o + 1 + 7) // 8) * 8   # narrow, sublane-aligned output width

    # layer 1: concat critic|actor -> [I, 2H] weights, [1, 2H] bias
    w1 = jnp.concatenate([params["w1c"], params["w1a"]], axis=1)
    b1 = jnp.concatenate([params["b1c"], params["b1a"]], axis=1)

    # layer 2: block-diagonal [2H, out_w]; value in col 0, logits in cols 1..O
    w2 = jnp.zeros((2 * h, out_w), jnp.float32)
    w2 = w2.at[:h, 0:1].set(params["w2c"])
    w2 = w2.at[h:, 1:1 + o].set(params["w2a"])
    b2 = jnp.zeros((1, out_w), jnp.float32)
    b2 = b2.at[:, 0:1].set(params["b2c"])
    b2 = b2.at[:, 1:1 + o].set(params["b2a"])
    return dict(w1=w1, b1=b1, w2=w2, b2=b2)


def _batch_tile(batch, max_tile=4096):
    """Largest multiple-of-8 batch tile, capped at max_tile (cdiv grid)."""
    b8 = ((batch + 7) // 8) * 8
    return min(b8, max_tile)


def actor_critic_forward(x, packed, num_outputs):
    """Fused actor-critic forward. Returns (probs [B, O], value [B, 1])."""
    batch, f_in = x.shape
    w1, b1, w2, b2 = packed["w1"], packed["b1"], packed["w2"], packed["b2"]
    h2 = w1.shape[1]          # 2 * hidden
    out_w = w2.shape[1]       # round_up(O + 1, 8)

    tb = _batch_tile(batch)
    grid = (pl.cdiv(batch, tb),)   # per-row compute -> partial tail tile is safe

    kernel = functools.partial(_actor_critic_kernel, num_outputs=num_outputs)
    out = pl.pallas_call(
        kernel,
        out_shape=jax.ShapeDtypeStruct((batch, out_w), jnp.float32),
        grid=grid,
        in_specs=[
            pl.BlockSpec((tb, f_in), lambda i: (i, 0)),     # x tile (pipelined)
            pl.BlockSpec((f_in, h2), lambda i: (0, 0)),     # fused W1 (resident)
            pl.BlockSpec((1, h2), lambda i: (0, 0)),        # fused b1 (resident)
            pl.BlockSpec((h2, out_w), lambda i: (0, 0)),    # block-diag W2 (resident)
            pl.BlockSpec((1, out_w), lambda i: (0, 0)),     # fused b2 (resident)
        ],
        out_specs=pl.BlockSpec((tb, out_w), lambda i: (i, 0)),
        compiler_params=pltpu.CompilerParams(
            dimension_semantics=("parallel",)),
    )(x, w1, b1, w2, b2)

    value = out[:, 0:1]
    probs = out[:, 1:1 + num_outputs]
    return probs, value


def init_params(key, num_inputs, num_outputs, hidden_size):
    """Deterministic synthetic parameters matching the nn.Module shapes."""
    ks = jax.random.split(key, 8)

    def lin(kw, kb, fan_in, fan_out):
        bound = 1.0 / jnp.sqrt(jnp.float32(fan_in))
        w = jax.random.uniform(kw, (fan_in, fan_out), jnp.float32, -bound, bound)
        b = jax.random.uniform(kb, (1, fan_out), jnp.float32, -bound, bound)
        return w, b

    w1c, b1c = lin(ks[0], ks[1], num_inputs, hidden_size)
    w2c, b2c = lin(ks[2], ks[3], hidden_size, 1)
    w1a, b1a = lin(ks[4], ks[5], num_inputs, hidden_size)
    w2a, b2a = lin(ks[6], ks[7], hidden_size, num_outputs)
    return dict(w1c=w1c, b1c=b1c, w2c=w2c, b2c=b2c,
                w1a=w1a, b1a=b1a, w2a=w2a, b2a=b2a)


def reference_forward(x, p):
    hc = jnp.maximum(x @ p["w1c"] + p["b1c"], 0.0)
    value = hc @ p["w2c"] + p["b2c"]
    ha = jnp.maximum(x @ p["w1a"] + p["b1a"], 0.0)
    logits = ha @ p["w2a"] + p["b2a"]
    probs = jax.nn.softmax(logits, axis=1)
    return probs, value


if __name__ == "__main__":
    num_inputs, num_outputs, hidden_size = 16, 4, 32
    batch = 8

    key = jax.random.PRNGKey(0)
    k_x, k_p = jax.random.split(key)
    x = jax.random.normal(k_x, (batch, num_inputs), jnp.float32)
    params = init_params(k_p, num_inputs, num_outputs, hidden_size)

    # Pack once (init-time), reuse across forward calls.
    packed = pack_params(params, num_outputs, hidden_size)

    probs, value = actor_critic_forward(x, packed, num_outputs)
    probs = jax.block_until_ready(probs)
    value = jax.block_until_ready(value)

    # sanity check against plain-JAX reference
    probs_ref, value_ref = reference_forward(x, params)
    assert probs.shape == (batch, num_outputs)
    assert value.shape == (batch, 1)
    assert jnp.allclose(value, value_ref, atol=1e-4, rtol=1e-4)
    assert jnp.allclose(probs, probs_ref, atol=1e-4, rtol=1e-4)
    # exact-reciprocal softmax: probs normalize to float32 precision
    assert jnp.allclose(jnp.sum(probs, axis=1), 1.0, atol=1e-4)

    print("KERNEL_OK")
</pallas_src>

<mosaic_0001>
module attributes {stable_mosaic.version = 11 : i64} {
  func.func @_actor_critic_kernel(%arg0: i32, %arg1: memref<8x16xf32, #tpu.memory_space<vmem>>, %arg2: memref<16x64xf32, #tpu.memory_space<vmem>>, %arg3: memref<1x64xf32, #tpu.memory_space<vmem>>, %arg4: memref<64x8xf32, #tpu.memory_space<vmem>>, %arg5: memref<1x8xf32, #tpu.memory_space<vmem>>, %arg6: memref<8x8xf32, #tpu.memory_space<vmem>>) attributes {dimension_semantics = [#tpu.dimension_semantics<parallel>], iteration_bounds = array<i64: 1>, scalar_prefetch = 0 : i64, scratch_operands = 0 : i64, tpu.core_type = #tpu.core_type<tc>, window_params = [{transform_indices = @transform_0, window_bounds = array<i64: 8, 16>}, {pipeline_mode = #tpu.pipeline_mode<synchronous>, transform_indices = @transform_1, window_bounds = array<i64: 16, 64>}, {pipeline_mode = #tpu.pipeline_mode<synchronous>, transform_indices = @transform_2, window_bounds = array<i64: 1, 64>}, {pipeline_mode = #tpu.pipeline_mode<synchronous>, transform_indices = @transform_3, window_bounds = array<i64: 64, 8>}, {pipeline_mode = #tpu.pipeline_mode<synchronous>, transform_indices = @transform_4, window_bounds = array<i64: 1, 8>}, {transform_indices = @transform_5, window_bounds = array<i64: 8, 8>}]} {
    %c0 = arith.constant 0 : index
    %c0_0 = arith.constant 0 : index
    %0 = vector.load %arg1[%c0, %c0_0] : memref<8x16xf32, #tpu.memory_space<vmem>>, vector<8x16xf32>
    %c0_1 = arith.constant 0 : index
    %c0_2 = arith.constant 0 : index
    %1 = vector.load %arg2[%c0_1, %c0_2] : memref<16x64xf32, #tpu.memory_space<vmem>>, vector<16x64xf32>
    %cst = arith.constant dense<0.000000e+00> : vector<8x64xf32>
    %2 = tpu.matmul %0, %1, %cst {dimension_numbers = #tpu.dot_dimension_numbers<[1], [0], [0], [1], [0, 0, 1, 1], [], []>} : vector<8x16xf32>, vector<16x64xf32>, vector<8x64xf32> -> vector<8x64xf32>
    %c0_3 = arith.constant 0 : index
    %c0_4 = arith.constant 0 : index
    %3 = vector.load %arg3[%c0_3, %c0_4] : memref<1x64xf32, #tpu.memory_space<vmem>>, vector<1x64xf32>
    %4 = vector.broadcast %3 : vector<1x64xf32> to vector<8x64xf32>
    %5 = arith.addf %2, %4 : vector<8x64xf32>
    %cst_5 = arith.constant 0.000000e+00 : f32
    %6 = vector.broadcast %cst_5 : f32 to vector<8x64xf32>
    %7 = arith.maximumf %5, %6 : vector<8x64xf32>
    %c0_6 = arith.constant 0 : index
    %c0_7 = arith.constant 0 : index
    %8 = vector.load %arg4[%c0_6, %c0_7] : memref<64x8xf32, #tpu.memory_space<vmem>>, vector<64x8xf32>
    %cst_8 = arith.constant dense<0.000000e+00> : vector<8x8xf32>
    %9 = tpu.matmul %7, %8, %cst_8 {dimension_numbers = #tpu.dot_dimension_numbers<[1], [0], [0], [1], [0, 0, 1, 1], [], []>} : vector<8x64xf32>, vector<64x8xf32>, vector<8x8xf32> -> vector<8x8xf32>
    %c0_9 = arith.constant 0 : index
    %c0_10 = arith.constant 0 : index
    %10 = vector.load %arg5[%c0_9, %c0_10] : memref<1x8xf32, #tpu.memory_space<vmem>>, vector<1x8xf32>
    %11 = vector.broadcast %10 : vector<1x8xf32> to vector<8x8xf32>
    %12 = arith.addf %9, %11 : vector<8x8xf32>
    %13 = tpu.iota {dimensions = array<i32: 1>} : vector<8x8xi32>
    %c1_i32 = arith.constant 1 : i32
    %14 = vector.broadcast %c1_i32 : i32 to vector<8x8xi32>
    %15 = arith.cmpi sge, %13, %14 : vector<8x8xi32>
    %c5_i32 = arith.constant 5 : i32
    %16 = vector.broadcast %c5_i32 : i32 to vector<8x8xi32>
    %17 = arith.cmpi slt, %13, %16 : vector<8x8xi32>
    %18 = arith.andi %15, %17 : vector<8x8xi1>
    %cst_11 = arith.constant 0xFF800000 : f32
    %19 = vector.broadcast %cst_11 : f32 to vector<8x8xf32>
    %20 = arith.select %18, %12, %19 : vector<8x8xi1>, vector<8x8xf32>
    %cst_12 = arith.constant dense<0xFF800000> : vector<8xf32>
    %21 = vector.multi_reduction <maximumf>, %20, %cst_12 [1] : vector<8x8xf32> to vector<8xf32>
    %22 = vector.shape_cast %21 : vector<8xf32> to vector<8x1xf32>
    %23 = vector.broadcast %22 : vector<8x1xf32> to vector<8x8xf32>
    %24 = arith.subf %20, %23 : vector<8x8xf32>
    %25 = math.exp %24 : vector<8x8xf32>
    %cst_13 = arith.constant dense<0.000000e+00> : vector<8xf32>
    %26 = vector.multi_reduction <add>, %25, %cst_13 [1] : vector<8x8xf32> to vector<8xf32>
    %27 = vector.shape_cast %26 : vector<8xf32> to vector<8x1xf32>
    %28 = vector.broadcast %27 : vector<8x1xf32> to vector<8x8xf32>
    %29 = arith.divf %25, %28 : vector<8x8xf32>
    %c0_i32 = arith.constant 0 : i32
    %30 = vector.broadcast %c0_i32 : i32 to vector<8x8xi32>
    %31 = arith.cmpi eq, %13, %30 : vector<8x8xi32>
    %32 = arith.select %31, %12, %29 : vector<8x8xi1>, vector<8x8xf32>
    %c0_14 = arith.constant 0 : index
    %c0_15 = arith.constant 0 : index
    %33 = vector.load %arg6[%c0_14, %c0_15] : memref<8x8xf32, #tpu.memory_space<vmem>>, vector<8x8xf32>
    tpu.vector_store %arg6[%c0_14, %c0_15], %32 {strides = array<i32>} : memref<8x8xf32, #tpu.memory_space<vmem>>, vector<8x8xf32>,
    return
  }
  func.func @transform_0(%arg0: i32) -> (i32, i32) {
    %c0_i32 = arith.constant 0 : i32
    %c0_i32_0 = arith.constant 0 : i32
    return %arg0, %c0_i32 : i32, i32
  }
  func.func @transform_1(%arg0: i32) -> (i32, i32) {
    %c0_i32 = arith.constant 0 : i32
    %c0_i32_0 = arith.constant 0 : i32
    %c0_i32_1 = arith.constant 0 : i32
    return %c0_i32, %c0_i32_0 : i32, i32
  }
  func.func @transform_2(%arg0: i32) -> (i32, i32) {
    %c0_i32 = arith.constant 0 : i32
    %c0_i32_0 = arith.constant 0 : i32
    %c0_i32_1 = arith.constant 0 : i32
    return %c0_i32, %c0_i32_0 : i32, i32
  }
  func.func @transform_3(%arg0: i32) -> (i32, i32) {
    %c0_i32 = arith.constant 0 : i32
    %c0_i32_0 = arith.constant 0 : i32
    %c0_i32_1 = arith.constant 0 : i32
    return %c0_i32, %c0_i32_0 : i32, i32
  }
  func.func @transform_4(%arg0: i32) -> (i32, i32) {
    %c0_i32 = arith.constant 0 : i32
    %c0_i32_0 = arith.constant 0 : i32
    %c0_i32_1 = arith.constant 0 : i32
    return %c0_i32, %c0_i32_0 : i32, i32
  }
  func.func @transform_5(%arg0: i32) -> (i32, i32) {
    %c0_i32 = arith.constant 0 : i32
    %c0_i32_0 = arith.constant 0 : i32
    return %arg0, %c0_i32 : i32, i32
  }
}

</mosaic_0001>

<bundles_post_ra>
// kernel: tpu_custom_call.1
= control target key start
LH: loop header
LB: loop body
LE: loop exit
PB: predicated region body
PF: predicated region fallthrough
CT: control target
= control target key end

     0   :  { %v301_v1 = vmov 0.0   ;;  %vm302_vm0 = vmmov 0   ;;  %vm31_vm1 = vcmask 130048   ;;  %s381_s0 = inlined_call_operand.vmem [shape: f32[8,16], index: 0, kind: input, shape index: {}]   ;;  %s382_s1 = inlined_call_operand.vmem [shape: f32[16,64], index: 1, kind: input, shape index: {}]   ;;  %s383_s2 = inlined_call_operand.vmem [shape: f32[1,64], index: 2, kind: input, shape index: {}]   ;;  %s384_s3 = inlined_call_operand.vmem [shape: f32[64,8], index: 3, kind: input, shape index: {}]   ;;  %s385_s4 = inlined_call_operand.vmem [shape: f32[1,8], index: 4, kind: input, shape index: {}]   ;;  %s386_s5 = inlined_call_operand.hbm [shape: f32[8,8], index: 5, kind: output, shape index: {}]  }
   0x1   :  { %v23_v0 = vld [vmem:[%s382_s1 + $0x8] sm:$0xff]  ;;  %246 = vmatprep.subr.mxu0 %v301_v1  ;;  %v22_v2 = vld [vmem:[%s382_s1] sm:$0xff]  ;;  %250 = vmatprep.mubr.msk.f32.mxu0 %vm302_vm0, %v301_v1  ;;  %v113_v3 = vld [vmem:[%s384_s3 + $0x38] sm:$0xff] }
   0x2   :  { %247 = vmatpush3.msra.mxu0 %v23_v0  ;;  %v21_v4 = vld [vmem:[%s381_s0] sm:$0xff]  ;;  %253 = vmatprep.subr.mxu1 %v301_v1  ;;  %v112_v5 = vld [vmem:[%s384_s3 + $0x30] sm:$0xff] }
   0x3   :  { %248 = vmatprep.subr.mxu0 %v301_v1  ;;  %254 = vmatpush3.msra.mxu1 %v113_v3 }
   0x4   :  { %10 = vsyncpa [#allocation3], 0  ;;  %249 = vmatpush3.msra.mxu0 %v22_v2  ;;  %255 = vmatprep.subr.mxu1 %v301_v1  ;;  %v111_v6 = vld [vmem:[%s384_s3 + $0x28] sm:$0xff]  ;;  %v110_v7 = vld [vmem:[%s384_s3 + $0x20] sm:$0xff]  ;;  %vm121_vm2 = vcmask 523264   ;;  %v195_v17 = vlaneseq  ;;  %vm201_vm6 = vcmask 64512  }
   0x5   :  { %251 = vmatmul.mubr.msk.f32.vlgmr.msra.gmra.mxu0 %vm31_vm1, %v21_v4  ;;  %256 = vmatpush3.msra.mxu1 %v112_v5  ;;  %v109_v8 = vld [vmem:[%s384_s3 + $0x18] sm:$0xff]  ;;  %v108_v9 = vld [vmem:[%s384_s3 + $0x10] sm:$0xff]  ;;  %v107_v10 = vld [vmem:[%s384_s3 + $0x8] sm:$0xff] }
   0x6   :  { %257 = vmatprep.subr.mxu1 %v301_v1  ;;  %269 = vmatprep.mubr.msk.f32.mxu1 %vm302_vm0, %v301_v1  ;;  %v106_v11 = vld [vmem:[%s384_s3] sm:$0xff]  ;;  %v196_v18 = vand.u32 127, %v195_v17 }
   0x7   :  { %258 = vmatpush3.msra.mxu1 %v111_v6  ;;  %v230_v12 = vld [vmem:[%s383_s2] ss:$0 sm:$0xff]  ;;  %s303_s2 = smov [#allocation2]  }
   0x8   :  { %259 = vmatprep.subr.mxu1 %v301_v1  ;;  %vm197_vm3 = vcmp.ge.s32.totalorder %v196_v18, 1  ;;  %vm198_vm4 = vcmp.lt.s32.totalorder %v196_v18, 5  ;;  %v232_v19 = vld [vmem:[%s385_s4] ss:$0 sm:$0xff]  ;;  %s222_s3 = sshll.u32 %s303_s2, 4  ;;  %vm213_vm7 = vcmp.eq.s32.totalorder %v196_v18, 0  ;;  %s223_s3 = int_to_ptr.vmem [resolvable:$true] %s222_s3 }
   0x9   :  { %260 = vmatpush3.msra.mxu1 %v110_v7  ;;  %vm199_vm5 = vmand %vm197_vm3, %vm198_vm4  ;;  %s279_s4 = scalar_lea.vmem %s223_s3, 128  ;;  %p284_p1 = scmp.lt.s32.totalorder %s223_s3, %s223_s3 }
   0xa   :  { %261 = vmatprep.subr.mxu1 %v301_v1  ;;  %p280_p0 = scmp.ne.s32.totalorder %s223_s3, %s279_s4  ;;  %p285_p2 = scmp.lt.s32.totalorder %s279_s4, %s279_s4 }
   0xb   :  { %262 = vmatpush3.msra.mxu1 %v109_v8 }
   0xc   :  { %263 = vmatprep.subr.mxu1 %v301_v1  ;;  %p286_p3 = por %p285_p2, %p284_p1 }
   0xd   :  { %264 = vmatpush3.msra.mxu1 %v108_v9 }
   0xe   :  { %265 = vmatprep.subr.mxu1 %v301_v1  ;;  %p287_p4 = pnand %p286_p3, %p280_p0 }
   0xf   :  { %266 = vmatpush3.msra.mxu1 %v107_v10 }
  0x10   :  { %267 = vmatprep.subr.mxu1 %v301_v1 }
  0x11   :  { %268 = vmatpush3.msra.mxu1 %v106_v11 }
  0xc5   :  { %v101_v13 = vpop.f32.mrf.mxu0 }
  0xc6   :  { %v102_v14 = vadd.f32 %v230_v12, %v101_v13 }
  0xc7   :  { %v252_v15 = vpop.f32.mrf.mxu0 }
  0xc8   :  { %v105_v16 = vmax.f32 %v102_v14, 0.0 }
  0xca   :  { %270 = vmatmul.mubr.msk.f32.vlgmr.msra.gmra.mxu1 %vm121_vm2, %v105_v16 }
 0x18a   :  { %v191_v20 = vpop.f32.mrf.mxu1 }
 0x18b   :  { %v192_v21 = vadd.f32 %v232_v19, %v191_v20 }
 0x18c   :  { %v271_v22 = vpop.f32.mrf.mxu1 }
 0x18d   :  { %v200_v23 = vsel %vm199_vm5, %v192_v21, -inf }
 0x18e   :  { %v202_v24 = vsel %vm201_vm6, %v200_v23, -inf }
 0x18f   :  { %203 = vmax.xlane.f32.xlu0 %v202_v24 }
 0x218   :  { %v204_v25 = vpop.xlane.xlu0 %203 }
 0x219   :  { %v205_v26 = vsub.f32 %v200_v23, %v204_v25 }
 0x21b   :  { %v206_v27 = vmul.f32 1.442695, %v205_v26 }
 0x21d   :  { %275 = vpow2.f32 %v206_v27 }
 0x22a   :  { %v276_v28 = vpop.eup %275 }
 0x22b   :  { %v208_v29 = vsel %vm201_vm6, %v276_v28, 0.0 }
 0x22c   :  { %209 = vadd.xlane.f32.xlu0 %v208_v29 }
 0x2b5   :  { %v210_v30 = vpop.xlane.xlu0 %209 }
 0x2b6   :  { %277 = vrcp.f32 %v210_v30 }
 0x2c3   :  { %v278_v31 = vpop.eup %277 }
 0x2c4   :  { %v212_v32 = vmul.f32 %v278_v31, %v276_v28 }
 0x2c6   :  { %v214_v33 = vsel %vm213_vm7, %v192_v21, %v212_v32 }
 0x2c7   :  { %215 = vst.msk [vmem:[#allocation2] sm:$0xff] %vm201_vm6, %v214_v33 }
 0x2c8   :  { %290 = shalt.err (!%p287_p4)
}
 0x2c9   :  { %225 = dma.vmem_to_hbm [thread:$0]  %s223_s3, 128, %s386_s5, [#allocation3]  }
 0x2ca   :  { %299 = dma.done.wait [#allocation3], 128  }
 0x2cb   :  { %300 = vsyncadd [#allocation3], 4294967168 }
 0x2cc   :  { %229 = vsyncpa [#allocation3], 1 }

</bundles_post_ra>
